<compile_context>
chip_gen: v7x
topology: tpu7x:2x2x1
jax: 0.10.0
libtpu: 0.0.40
codegen_flags: <defaults>
</compile_context>

<pallas_src>
import functools

import jax
import jax.numpy as jnp
from jax import lax
from jax.experimental import pallas as pl
from jax.experimental.pallas import tpu as pltpu


def _round_up(x, m):
    return (x + m - 1) // m * m


def _bert_output_kernel(x_ref, w_ref, b_ref, res_ref, gamma_ref, beta_ref, o_ref, *, eps):
    # Dense: (tm, K) @ (K, N) on the MXU; bf16 operands, f32 accumulation.
    y = jnp.dot(x_ref[...], w_ref[...], preferred_element_type=jnp.float32)
    y = y + b_ref[...]                                   # bias (1, N), f32, broadcasts over rows

    # Dropout is identity at inference (hidden_dropout_prob only scales during training).
    # TODO(synk): training-mode dropout (pltpu.prng_random_bits mask) not emitted here.

    h = y + res_ref[...].astype(jnp.float32)             # residual add in f32

    # BertLayerNorm over the hidden (last) axis, biased variance like the reference.
    mu = jnp.mean(h, axis=-1, keepdims=True)
    d = h - mu
    var = jnp.mean(d * d, axis=-1, keepdims=True)
    out = d * lax.rsqrt(var + eps) * gamma_ref[...] + beta_ref[...]
    o_ref[...] = out.astype(o_ref.dtype)


def _default_vmem_limit_bytes():
    # ~3/4 of physical VMEM, capped at 96 MiB (=> ~96 MiB on v5e/v6e, ~48 MiB on v7x).
    try:
        cap = pltpu.get_tpu_info().vmem_capacity_bytes
    except Exception:
        cap = 64 * 1024 * 1024
    return int(min(96 * 1024 * 1024, cap * 3 // 4))


def bert_output(hidden_states, input_tensor, w, b, gamma, beta, *,
                eps=1e-12, tm=256, compute_dtype=jnp.bfloat16):
    """hidden_states: (B, S, K) intermediate activations
       input_tensor:  (B, S, N) residual input
       w: (K, N), b/gamma/beta: (N,)"""
    B, S, K = hidden_states.shape
    N = input_tensor.shape[-1]
    M = B * S

    # Row tile: large for MXU utilization on real shapes, but never bigger than the
    # (8-aligned) row count so tiny inputs are not massively over-padded.
    tm = min(tm, _round_up(M, 8))
    M_pad = _round_up(M, tm)

    # Pre-cast / reshape once in the wrapper (not per grid step inside the kernel).
    x2 = hidden_states.reshape(M, K).astype(compute_dtype)
    r2 = input_tensor.reshape(M, N)
    if M_pad != M:
        x2 = jnp.pad(x2, ((0, M_pad - M), (0, 0)))
        r2 = jnp.pad(r2, ((0, M_pad - M), (0, 0)))
    wc = w.astype(compute_dtype)
    b2 = b.reshape(1, N).astype(jnp.float32)
    g2 = gamma.reshape(1, N).astype(jnp.float32)
    be2 = beta.reshape(1, N).astype(jnp.float32)

    out_dtype = hidden_states.dtype
    cost = pl.CostEstimate(
        flops=2 * M_pad * K * N,
        transcendentals=M_pad,  # one rsqrt per row
        bytes_accessed=(x2.size * x2.dtype.itemsize
                        + wc.size * wc.dtype.itemsize
                        + r2.size * r2.dtype.itemsize
                        + M_pad * N * jnp.dtype(out_dtype).itemsize
                        + 3 * N * 4),
    )

    def run(single_buffer_consts):
        # Constant-index operands never change across the grid: a single VMEM buffer is
        # enough (saves ~half the weight VMEM footprint, leaving room for a bigger tm).
        const_kwargs = dict(pipeline_mode=pl.Buffered(1)) if single_buffer_consts else {}
        return pl.pallas_call(
            functools.partial(_bert_output_kernel, eps=eps),
            out_shape=jax.ShapeDtypeStruct((M_pad, N), out_dtype),
            grid_spec=pltpu.PrefetchScalarGridSpec(
                num_scalar_prefetch=0,
                grid=(M_pad // tm,),
                in_specs=[
                    pl.BlockSpec((tm, K), lambda i: (i, 0)),                  # x tile (bf16)
                    pl.BlockSpec((K, N), lambda i: (0, 0), **const_kwargs),   # weight (bf16)
                    pl.BlockSpec((1, N), lambda i: (0, 0), **const_kwargs),   # bias (f32)
                    pl.BlockSpec((tm, N), lambda i: (i, 0)),                  # residual tile
                    pl.BlockSpec((1, N), lambda i: (0, 0), **const_kwargs),   # LN gamma (f32)
                    pl.BlockSpec((1, N), lambda i: (0, 0), **const_kwargs),   # LN beta (f32)
                ],
                out_specs=pl.BlockSpec((tm, N), lambda i: (i, 0)),
            ),
            compiler_params=pltpu.CompilerParams(
                dimension_semantics=("parallel",),        # shards rows across TCs on v7x
                vmem_limit_bytes=_default_vmem_limit_bytes(),
            ),
            cost_estimate=cost,
        )(x2, wc, b2, r2, g2, be2)

    try:
        out = run(single_buffer_consts=True)
    except Exception:
        # Fallback if this JAX build rejects single-buffered (Buffered(1)) BlockSpecs.
        out = run(single_buffer_consts=False)

    return out[:M].reshape(B, S, N)


def _reference(hidden_states, input_tensor, w, b, gamma, beta, eps=1e-12,
               compute_dtype=jnp.bfloat16):
    # Mirrors the kernel numerics: bf16 MXU operands, f32 accumulation, f32 LayerNorm.
    y = jnp.einsum("bsk,kn->bsn",
                   hidden_states.astype(compute_dtype), w.astype(compute_dtype),
                   preferred_element_type=jnp.float32) + b.astype(jnp.float32)
    h = y + input_tensor.astype(jnp.float32)
    mu = jnp.mean(h, axis=-1, keepdims=True)
    var = jnp.mean((h - mu) ** 2, axis=-1, keepdims=True)
    return (h - mu) / jnp.sqrt(var + eps) * gamma + beta


if __name__ == "__main__":
    # Small BERT-ish config: hidden_size=128, intermediate_size=256, layer_norm_eps=1e-12,
    # hidden_dropout_prob inactive at inference.
    B, S = 2, 8
    INTERMEDIATE, HIDDEN = 256, 128
    EPS = 1e-12

    key = jax.random.PRNGKey(0)
    k_x, k_r, k_w, k_b, k_g, k_be = jax.random.split(key, 6)

    hidden_states = jax.random.normal(k_x, (B, S, INTERMEDIATE), dtype=jnp.float32)
    input_tensor = jax.random.normal(k_r, (B, S, HIDDEN), dtype=jnp.float32)

    # Deterministic "Linear" + "LayerNorm" parameters (synthetic init).
    w = 0.02 * jax.random.normal(k_w, (INTERMEDIATE, HIDDEN), dtype=jnp.float32)
    b = 0.01 * jax.random.normal(k_b, (HIDDEN,), dtype=jnp.float32)
    gamma = 1.0 + 0.05 * jax.random.normal(k_g, (HIDDEN,), dtype=jnp.float32)
    beta = 0.05 * jax.random.normal(k_be, (HIDDEN,), dtype=jnp.float32)

    out = bert_output(hidden_states, input_tensor, w, b, gamma, beta, eps=EPS)
    out = jax.block_until_ready(out)

    ref = _reference(hidden_states, input_tensor, w, b, gamma, beta, eps=EPS)
    assert out.shape == (B, S, HIDDEN)
    assert jnp.allclose(out, ref, atol=2e-3, rtol=2e-3), "mismatch vs reference"

    print("KERNEL_OK")
</pallas_src>

<mosaic_0001>
module attributes {stable_mosaic.version = 11 : i64} {
  func.func @_bert_output_kernel(%arg0: i32, %arg1: memref<16x256xbf16, #tpu.memory_space<vmem>>, %arg2: memref<256x128xbf16, #tpu.memory_space<vmem>>, %arg3: memref<1x128xf32, #tpu.memory_space<vmem>>, %arg4: memref<16x128xf32, #tpu.memory_space<vmem>>, %arg5: memref<1x128xf32, #tpu.memory_space<vmem>>, %arg6: memref<1x128xf32, #tpu.memory_space<vmem>>, %arg7: memref<16x128xf32, #tpu.memory_space<vmem>>) attributes {dimension_semantics = [#tpu.dimension_semantics<parallel>], iteration_bounds = array<i64: 1>, scalar_prefetch = 0 : i64, scratch_operands = 0 : i64, tpu.core_type = #tpu.core_type<tc>, window_params = [{transform_indices = @transform_0, window_bounds = array<i64: 16, 256>}, {pipeline_mode = #tpu.pipeline_mode<synchronous>, transform_indices = @transform_1, window_bounds = array<i64: 256, 128>}, {pipeline_mode = #tpu.pipeline_mode<synchronous>, transform_indices = @transform_2, window_bounds = array<i64: 1, 128>}, {transform_indices = @transform_3, window_bounds = array<i64: 16, 128>}, {pipeline_mode = #tpu.pipeline_mode<synchronous>, transform_indices = @transform_4, window_bounds = array<i64: 1, 128>}, {pipeline_mode = #tpu.pipeline_mode<synchronous>, transform_indices = @transform_5, window_bounds = array<i64: 1, 128>}, {transform_indices = @transform_6, window_bounds = array<i64: 16, 128>}]} {
    %c0 = arith.constant 0 : index
    %c0_0 = arith.constant 0 : index
    %0 = vector.load %arg1[%c0, %c0_0] : memref<16x256xbf16, #tpu.memory_space<vmem>>, vector<16x256xbf16>
    %c0_1 = arith.constant 0 : index
    %c0_2 = arith.constant 0 : index
    %1 = vector.load %arg2[%c0_1, %c0_2] : memref<256x128xbf16, #tpu.memory_space<vmem>>, vector<256x128xbf16>
    %cst = arith.constant dense<0.000000e+00> : vector<16x128xf32>
    %2 = tpu.matmul %0, %1, %cst {dimension_numbers = #tpu.dot_dimension_numbers<[1], [0], [0], [1], [0, 0, 1, 1], [], []>} : vector<16x256xbf16>, vector<256x128xbf16>, vector<16x128xf32> -> vector<16x128xf32>
    %c0_3 = arith.constant 0 : index
    %c0_4 = arith.constant 0 : index
    %3 = vector.load %arg3[%c0_3, %c0_4] : memref<1x128xf32, #tpu.memory_space<vmem>>, vector<1x128xf32>
    %4 = vector.broadcast %3 : vector<1x128xf32> to vector<16x128xf32>
    %5 = arith.addf %2, %4 : vector<16x128xf32>
    %c0_5 = arith.constant 0 : index
    %c0_6 = arith.constant 0 : index
    %6 = vector.load %arg4[%c0_5, %c0_6] : memref<16x128xf32, #tpu.memory_space<vmem>>, vector<16x128xf32>
    %7 = arith.addf %5, %6 : vector<16x128xf32>
    %cst_7 = arith.constant dense<0.000000e+00> : vector<16xf32>
    %8 = vector.multi_reduction <add>, %7, %cst_7 [1] : vector<16x128xf32> to vector<16xf32>
    %9 = vector.shape_cast %8 : vector<16xf32> to vector<16x1xf32>
    %cst_8 = arith.constant 1.280000e+02 : f32
    %10 = vector.broadcast %cst_8 : f32 to vector<16x1xf32>
    %11 = arith.divf %9, %10 : vector<16x1xf32>
    %12 = vector.broadcast %11 : vector<16x1xf32> to vector<16x128xf32>
    %13 = arith.subf %7, %12 : vector<16x128xf32>
    %14 = arith.mulf %13, %13 : vector<16x128xf32>
    %cst_9 = arith.constant dense<0.000000e+00> : vector<16xf32>
    %15 = vector.multi_reduction <add>, %14, %cst_9 [1] : vector<16x128xf32> to vector<16xf32>
    %16 = vector.shape_cast %15 : vector<16xf32> to vector<16x1xf32>
    %cst_10 = arith.constant 1.280000e+02 : f32
    %17 = vector.broadcast %cst_10 : f32 to vector<16x1xf32>
    %18 = arith.divf %16, %17 : vector<16x1xf32>
    %cst_11 = arith.constant 9.99999996E-13 : f32
    %19 = vector.broadcast %cst_11 : f32 to vector<16x1xf32>
    %20 = arith.addf %18, %19 : vector<16x1xf32>
    %21 = math.rsqrt %20 : vector<16x1xf32>
    %22 = vector.broadcast %21 : vector<16x1xf32> to vector<16x128xf32>
    %23 = arith.mulf %13, %22 : vector<16x128xf32>
    %c0_12 = arith.constant 0 : index
    %c0_13 = arith.constant 0 : index
    %24 = vector.load %arg5[%c0_12, %c0_13] : memref<1x128xf32, #tpu.memory_space<vmem>>, vector<1x128xf32>
    %25 = vector.broadcast %24 : vector<1x128xf32> to vector<16x128xf32>
    %26 = arith.mulf %23, %25 : vector<16x128xf32>
    %c0_14 = arith.constant 0 : index
    %c0_15 = arith.constant 0 : index
    %27 = vector.load %arg6[%c0_14, %c0_15] : memref<1x128xf32, #tpu.memory_space<vmem>>, vector<1x128xf32>
    %28 = vector.broadcast %27 : vector<1x128xf32> to vector<16x128xf32>
    %29 = arith.addf %26, %28 : vector<16x128xf32>
    %c0_16 = arith.constant 0 : index
    %c0_17 = arith.constant 0 : index
    %30 = vector.load %arg7[%c0_16, %c0_17] : memref<16x128xf32, #tpu.memory_space<vmem>>, vector<16x128xf32>
    tpu.vector_store %arg7[%c0_16, %c0_17], %29 {strides = array<i32>} : memref<16x128xf32, #tpu.memory_space<vmem>>, vector<16x128xf32>,
    return
  }
  func.func @transform_0(%arg0: i32) -> (i32, i32) {
    %c0_i32 = arith.constant 0 : i32
    %c0_i32_0 = arith.constant 0 : i32
    return %arg0, %c0_i32 : i32, i32
  }
  func.func @transform_1(%arg0: i32) -> (i32, i32) {
    %c0_i32 = arith.constant 0 : i32
    %c0_i32_0 = arith.constant 0 : i32
    %c0_i32_1 = arith.constant 0 : i32
    return %c0_i32, %c0_i32_0 : i32, i32
  }
  func.func @transform_2(%arg0: i32) -> (i32, i32) {
    %c0_i32 = arith.constant 0 : i32
    %c0_i32_0 = arith.constant 0 : i32
    %c0_i32_1 = arith.constant 0 : i32
    return %c0_i32, %c0_i32_0 : i32, i32
  }
  func.func @transform_3(%arg0: i32) -> (i32, i32) {
    %c0_i32 = arith.constant 0 : i32
    %c0_i32_0 = arith.constant 0 : i32
    return %arg0, %c0_i32 : i32, i32
  }
  func.func @transform_4(%arg0: i32) -> (i32, i32) {
    %c0_i32 = arith.constant 0 : i32
    %c0_i32_0 = arith.constant 0 : i32
    %c0_i32_1 = arith.constant 0 : i32
    return %c0_i32, %c0_i32_0 : i32, i32
  }
  func.func @transform_5(%arg0: i32) -> (i32, i32) {
    %c0_i32 = arith.constant 0 : i32
    %c0_i32_0 = arith.constant 0 : i32
    %c0_i32_1 = arith.constant 0 : i32
    return %c0_i32, %c0_i32_0 : i32, i32
  }
  func.func @transform_6(%arg0: i32) -> (i32, i32) {
    %c0_i32 = arith.constant 0 : i32
    %c0_i32_0 = arith.constant 0 : i32
    return %arg0, %c0_i32 : i32, i32
  }
}

module attributes {stable_mosaic.version = 11 : i64} {
  func.func @_bert_output_kernel(%arg0: i32, %arg1: memref<16x256xbf16, #tpu.memory_space<vmem>>, %arg2: memref<256x128xbf16, #tpu.memory_space<vmem>>, %arg3: memref<1x128xf32, #tpu.memory_space<vmem>>, %arg4: memref<16x128xf32, #tpu.memory_space<vmem>>, %arg5: memref<1x128xf32, #tpu.memory_space<vmem>>, %arg6: memref<1x128xf32, #tpu.memory_space<vmem>>, %arg7: memref<16x128xf32, #tpu.memory_space<vmem>>) attributes {dimension_semantics = [#tpu.dimension_semantics<parallel>], iteration_bounds = array<i64: 1>, scalar_prefetch = 0 : i64, scratch_operands = 0 : i64, tpu.core_type = #tpu.core_type<tc>, window_params = [{transform_indices = @transform_0, window_bounds = array<i64: 16, 256>}, {pipeline_mode = #tpu.pipeline_mode<synchronous>, transform_indices = @transform_1, window_bounds = array<i64: 256, 128>}, {pipeline_mode = #tpu.pipeline_mode<synchronous>, transform_indices = @transform_2, window_bounds = array<i64: 1, 128>}, {transform_indices = @transform_3, window_bounds = array<i64: 16, 128>}, {pipeline_mode = #tpu.pipeline_mode<synchronous>, transform_indices = @transform_4, window_bounds = array<i64: 1, 128>}, {pipeline_mode = #tpu.pipeline_mode<synchronous>, transform_indices = @transform_5, window_bounds = array<i64: 1, 128>}, {transform_indices = @transform_6, window_bounds = array<i64: 16, 128>}]} {
    %c0 = arith.constant 0 : index
    %c0_0 = arith.constant 0 : index
    %0 = vector.load %arg1[%c0, %c0_0] : memref<16x256xbf16, #tpu.memory_space<vmem>>, vector<16x256xbf16>
    %c0_1 = arith.constant 0 : index
    %c0_2 = arith.constant 0 : index
    %1 = vector.load %arg2[%c0_1, %c0_2] : memref<256x128xbf16, #tpu.memory_space<vmem>>, vector<256x128xbf16>
    %cst = arith.constant dense<0.000000e+00> : vector<16x128xf32>
    %2 = tpu.matmul %0, %1, %cst {dimension_numbers = #tpu.dot_dimension_numbers<[1], [0], [0], [1], [0, 0, 1, 1], [], []>} : vector<16x256xbf16>, vector<256x128xbf16>, vector<16x128xf32> -> vector<16x128xf32>
    %c0_3 = arith.constant 0 : index
    %c0_4 = arith.constant 0 : index
    %3 = vector.load %arg3[%c0_3, %c0_4] : memref<1x128xf32, #tpu.memory_space<vmem>>, vector<1x128xf32>
    %4 = vector.broadcast %3 : vector<1x128xf32> to vector<16x128xf32>
    %5 = arith.addf %2, %4 : vector<16x128xf32>
    %c0_5 = arith.constant 0 : index
    %c0_6 = arith.constant 0 : index
    %6 = vector.load %arg4[%c0_5, %c0_6] : memref<16x128xf32, #tpu.memory_space<vmem>>, vector<16x128xf32>
    %7 = arith.addf %5, %6 : vector<16x128xf32>
    %cst_7 = arith.constant dense<0.000000e+00> : vector<16xf32>
    %8 = vector.multi_reduction <add>, %7, %cst_7 [1] : vector<16x128xf32> to vector<16xf32>
    %9 = vector.shape_cast %8 : vector<16xf32> to vector<16x1xf32>
    %cst_8 = arith.constant 1.280000e+02 : f32
    %10 = vector.broadcast %cst_8 : f32 to vector<16x1xf32>
    %11 = arith.divf %9, %10 : vector<16x1xf32>
    %12 = vector.broadcast %11 : vector<16x1xf32> to vector<16x128xf32>
    %13 = arith.subf %7, %12 : vector<16x128xf32>
    %14 = arith.mulf %13, %13 : vector<16x128xf32>
    %cst_9 = arith.constant dense<0.000000e+00> : vector<16xf32>
    %15 = vector.multi_reduction <add>, %14, %cst_9 [1] : vector<16x128xf32> to vector<16xf32>
    %16 = vector.shape_cast %15 : vector<16xf32> to vector<16x1xf32>
    %cst_10 = arith.constant 1.280000e+02 : f32
    %17 = vector.broadcast %cst_10 : f32 to vector<16x1xf32>
    %18 = arith.divf %16, %17 : vector<16x1xf32>
    %cst_11 = arith.constant 9.99999996E-13 : f32
    %19 = vector.broadcast %cst_11 : f32 to vector<16x1xf32>
    %20 = arith.addf %18, %19 : vector<16x1xf32>
    %21 = math.rsqrt %20 : vector<16x1xf32>
    %22 = vector.broadcast %21 : vector<16x1xf32> to vector<16x128xf32>
    %23 = arith.mulf %13, %22 : vector<16x128xf32>
    %c0_12 = arith.constant 0 : index
    %c0_13 = arith.constant 0 : index
    %24 = vector.load %arg5[%c0_12, %c0_13] : memref<1x128xf32, #tpu.memory_space<vmem>>, vector<1x128xf32>
    %25 = vector.broadcast %24 : vector<1x128xf32> to vector<16x128xf32>
    %26 = arith.mulf %23, %25 : vector<16x128xf32>
    %c0_14 = arith.constant 0 : index
    %c0_15 = arith.constant 0 : index
    %27 = vector.load %arg6[%c0_14, %c0_15] : memref<1x128xf32, #tpu.memory_space<vmem>>, vector<1x128xf32>
    %28 = vector.broadcast %27 : vector<1x128xf32> to vector<16x128xf32>
    %29 = arith.addf %26, %28 : vector<16x128xf32>
    %c0_16 = arith.constant 0 : index
    %c0_17 = arith.constant 0 : index
    %30 = vector.load %arg7[%c0_16, %c0_17] : memref<16x128xf32, #tpu.memory_space<vmem>>, vector<16x128xf32>
    tpu.vector_store %arg7[%c0_16, %c0_17], %29 {strides = array<i32>} : memref<16x128xf32, #tpu.memory_space<vmem>>, vector<16x128xf32>,
    return
  }
  func.func @transform_0(%arg0: i32) -> (i32, i32) {
    %c0_i32 = arith.constant 0 : i32
    %c0_i32_0 = arith.constant 0 : i32
    return %arg0, %c0_i32 : i32, i32
  }
  func.func @transform_1(%arg0: i32) -> (i32, i32) {
    %c0_i32 = arith.constant 0 : i32
    %c0_i32_0 = arith.constant 0 : i32
    %c0_i32_1 = arith.constant 0 : i32
    return %c0_i32, %c0_i32_0 : i32, i32
  }
  func.func @transform_2(%arg0: i32) -> (i32, i32) {
    %c0_i32 = arith.constant 0 : i32
    %c0_i32_0 = arith.constant 0 : i32
    %c0_i32_1 = arith.constant 0 : i32
    return %c0_i32, %c0_i32_0 : i32, i32
  }
  func.func @transform_3(%arg0: i32) -> (i32, i32) {
    %c0_i32 = arith.constant 0 : i32
    %c0_i32_0 = arith.constant 0 : i32
    return %arg0, %c0_i32 : i32, i32
  }
  func.func @transform_4(%arg0: i32) -> (i32, i32) {
    %c0_i32 = arith.constant 0 : i32
    %c0_i32_0 = arith.constant 0 : i32
    %c0_i32_1 = arith.constant 0 : i32
    return %c0_i32, %c0_i32_0 : i32, i32
  }
  func.func @transform_5(%arg0: i32) -> (i32, i32) {
    %c0_i32 = arith.constant 0 : i32
    %c0_i32_0 = arith.constant 0 : i32
    %c0_i32_1 = arith.constant 0 : i32
    return %c0_i32, %c0_i32_0 : i32, i32
  }
  func.func @transform_6(%arg0: i32) -> (i32, i32) {
    %c0_i32 = arith.constant 0 : i32
    %c0_i32_0 = arith.constant 0 : i32
    return %arg0, %c0_i32 : i32, i32
  }
}

</mosaic_0001>

<bundles_post_ra>
// kernel: tpu_custom_call.1
= control target key start
LH: loop header
LB: loop body
LE: loop exit
PB: predicated region body
PF: predicated region fallthrough
CT: control target
= control target key end

     0   :  { %11 = vsyncpa [#allocation3], 0  ;;  %s596_s0 = inlined_call_operand.hbm [shape: bf16[16,256], index: 0, kind: input, shape index: {}]   ;;  %s597_s1 = inlined_call_operand.hbm [shape: bf16[256,128], index: 1, kind: input, shape index: {}]   ;;  %s598_s2 = inlined_call_operand.vmem [shape: f32[1,128], index: 2, kind: input, shape index: {}]   ;;  %s599_s3 = inlined_call_operand.hbm [shape: f32[16,128], index: 3, kind: input, shape index: {}]   ;;  %s600_s4 = inlined_call_operand.vmem [shape: f32[1,128], index: 4, kind: input, shape index: {}]   ;;  %s601_s5 = inlined_call_operand.vmem [shape: f32[1,128], index: 5, kind: input, shape index: {}]   ;;  %s602_s6 = inlined_call_operand.hbm [shape: f32[16,128], index: 6, kind: output, shape index: {}]  }
   0x1   :  { %12 = vsyncpa [#allocation6], 0 }
   0x2   :  { %13 = vsyncpa [#allocation4], 0  ;;  %s487_s21 = smov [#allocation5]   ;;  %s393_s25 = scalar_lea.hbm %s597_s1, 2048 }
   0x3   :  { %s31_s22 = sshll.u32 %s487_s21, 4  ;;  %p394_p0 = scmp.ne.s32.totalorder %s597_s1, %s393_s25  ;;  %s32_s22 = int_to_ptr.vmem [resolvable:$true] %s31_s22 }
   0x4   :  { %p397_p1 = scmp.lt.u32.totalorder %s393_s25, %s597_s1 }
   0x6   :  { %p399_p2 = pnand %p397_p1, %p394_p0 }
   0x8   :  { %402 = shalt.err (!%p399_p2)
}
   0x9   :  { %s403_s30 = scalar_lea.vmem %s32_s22, 2048  ;;  %p408_p4 = scmp.lt.s32.totalorder %s32_s22, %s32_s22 }
   0xa   :  { %p404_p3 = scmp.ne.s32.totalorder %s32_s22, %s403_s30  ;;  %p409_p5 = scmp.lt.s32.totalorder %s403_s30, %s403_s30 }
   0xc   :  { %p410_p6 = por %p409_p5, %p408_p4 }
   0xe   :  { %p411_p7 = pnand %p410_p6, %p404_p3 }
  0x10   :  { %414 = shalt.err (!%p411_p7)
}
  0x11   :  { %s488_s7 = smov 64   ;;  %s489_s8 = smov 4  }
  0x12   :  { %37 = dma.hbm_to_vmem [thread:$0]  %s597_s1, 2048, %s32_s22, [#allocation6], %s488_s7, %s488_s7, %s489_s8  }
  0x13   :  { %s490_s11 = smov [#allocation2]   ;;  %s415_s15 = scalar_lea.hbm %s596_s0, 256 }
  0x14   :  { %s19_s12 = sshll.u32 %s490_s11, 4  ;;  %p416_p8 = scmp.ne.s32.totalorder %s596_s0, %s415_s15  ;;  %s20_s12 = int_to_ptr.vmem [resolvable:$true] %s19_s12 }
  0x15   :  { %p419_p9 = scmp.lt.u32.totalorder %s415_s15, %s596_s0 }
  0x17   :  { %p421_p10 = pnand %p419_p9, %p416_p8 }
  0x19   :  { %424 = shalt.err (!%p421_p10)
}
  0x1a   :  { %s425_s20 = scalar_lea.vmem %s20_s12, 256  ;;  %p430_p12 = scmp.lt.s32.totalorder %s20_s12, %s20_s12 }
  0x1b   :  { %p426_p11 = scmp.ne.s32.totalorder %s20_s12, %s425_s20  ;;  %p431_p13 = scmp.lt.s32.totalorder %s425_s20, %s425_s20 }
  0x1d   :  { %p432_p0 = por %p431_p13, %p430_p12 }
  0x1f   :  { %p433_p1 = pnand %p432_p0, %p426_p11 }
  0x21   :  { %436 = shalt.err (!%p433_p1)
}
  0x22   :  { %s491_s1 = smov 128   ;;  %s492_s21 = smov 8  }
  0x23   :  { %25 = dma.hbm_to_vmem [thread:$0]  %s596_s0, 256, %s20_s12, [#allocation3], %s491_s1, %s491_s1, %s492_s21  }
  0x24   :  { %s493_s24 = smov [#allocation7]   ;;  %s437_s28 = scalar_lea.hbm %s599_s3, 256 }
  0x25   :  { %s45_s25 = sshll.u32 %s493_s24, 4  ;;  %p438_p2 = scmp.ne.s32.totalorder %s599_s3, %s437_s28  ;;  %s46_s25 = int_to_ptr.vmem [resolvable:$true] %s45_s25 }
  0x26   :  { %p441_p3 = scmp.lt.u32.totalorder %s437_s28, %s599_s3 }
  0x28   :  { %p443_p4 = pnand %p441_p3, %p438_p2 }
  0x2a   :  { %446 = shalt.err (!%p443_p4)
}
  0x2b   :  { %s447_s9 = scalar_lea.vmem %s46_s25, 256  ;;  %p452_p6 = scmp.lt.s32.totalorder %s46_s25, %s46_s25 }
  0x2c   :  { %p448_p5 = scmp.ne.s32.totalorder %s46_s25, %s447_s9  ;;  %p453_p7 = scmp.lt.s32.totalorder %s447_s9, %s447_s9 }
  0x2e   :  { %p454_p8 = por %p453_p7, %p452_p6 }
  0x30   :  { %p455_p9 = pnand %p454_p8, %p448_p5 }
  0x32   :  { %458 = shalt.err (!%p455_p9)
}
  0x33   :  { %51 = dma.hbm_to_vmem [thread:$0]  %s599_s3, 256, %s46_s25, [#allocation6], %s491_s1, %s491_s1, %s492_s21  }
  0x34   :  { %481 = dma.done.wait [#allocation3], 256  }
  0x35   :  { %482 = vsyncadd [#allocation3], 4294967040 }
  0x36   :  { %483 = dma.done.wait [#allocation6], 2304  }
  0x37   :  { %484 = vsyncadd [#allocation6], 4294964992  ;;  %v370_v0 = vld [vmem:[#allocation5 + $0x40] sm:$0xff]   ;;  %v372_v2 = vld [vmem:[#allocation5 + $0x48] sm:$0xff]   ;;  %s494_s15 = smov [#allocation8]  }
  0x38   :  { %v371_v1 = vld [vmem:[#allocation5] sm:$0xff]   ;;  %340 = vmatprep.subr.bf16.mxu0 %v370_v0  ;;  %v373_v3 = vld [vmem:[#allocation5 + $0x8] sm:$0xff]   ;;  %v374_v4 = vld [vmem:[#allocation5 + $0x50] sm:$0xff]   ;;  %s306_s16 = sshll.u32 %s494_s15, 4  ;;  %s307_s16 = int_to_ptr.vmem [resolvable:$true] %s306_s16 }
  0x39   :  { %341 = vmatpush3.bf16.msra.mxu0 %v371_v1  ;;  %v375_v5 = vld [vmem:[#allocation5 + $0x10] sm:$0xff]   ;;  %v376_v6 = vld [vmem:[#allocation5 + $0x58] sm:$0xff]   ;;  %v378_v8 = vld [vmem:[#allocation5 + $0x60] sm:$0xff]   ;;  %s459_s17 = scalar_lea.vmem %s307_s16, 256  ;;  %p464_p11 = scmp.lt.s32.totalorder %s307_s16, %s307_s16 }
  0x3a   :  { %342 = vmatprep.subr.bf16.mxu0 %v372_v2  ;;  %v377_v7 = vld [vmem:[#allocation5 + $0x18] sm:$0xff]   ;;  %v379_v9 = vld [vmem:[#allocation5 + $0x20] sm:$0xff]   ;;  %v380_v10 = vld [vmem:[#allocation5 + $0x68] sm:$0xff]   ;;  %p460_p10 = scmp.ne.s32.totalorder %s307_s16, %s459_s17  ;;  %p465_p12 = scmp.lt.s32.totalorder %s459_s17, %s459_s17 }
  0x3b   :  { %v388_v11 = vld [vmem:[#allocation2 + $0x4] ss:$8 sps:$4 sm:$0xff]   ;;  %v381_v12 = vld [vmem:[#allocation5 + $0x28] sm:$0xff]   ;;  %v386_v17 = vld [vmem:[#allocation2] ss:$8 sps:$4 sm:$0xff]  }
  0x3c   :  { %245 = vmatprep.mubr.bf16.mxu0 %v388_v11  ;;  %v382_v13 = vld [vmem:[#allocation5 + $0x70] sm:$0xff]   ;;  %v384_v15 = vld [vmem:[#allocation5 + $0x78] sm:$0xff]   ;;  %v254_v24 = vld [vmem:[#allocation7] sm:$0xff]  ;;  %p466_p13 = por %p465_p12, %p464_p11 }
  0x3d   :  { %343 = vmatpush3.bf16.msra.mxu0 %v373_v3  ;;  %v383_v14 = vld [vmem:[#allocation5 + $0x30] sm:$0xff]   ;;  %v385_v16 = vld [vmem:[#allocation5 + $0x38] sm:$0xff]   ;;  %v255_v29 = vld [vmem:[#allocation7 + $0x8] sm:$0xff] }
  0x3e   :  { %344 = vmatprep.subr.bf16.mxu0 %v374_v4  ;;  %v319_v19 = vld [vmem:[%s598_s2] ss:$0 sm:$0xff]  ;;  %p467_p0 = pnand %p466_p13, %p460_p10 }
  0x3f   :  { %v338_v46 = vld [vmem:[%s600_s4] ss:$0 sm:$0xff] }
  0x40   :  { %v339_v48 = vld [vmem:[%s601_s5] ss:$0 sm:$0xff] }
  0x41   :  { %345 = vmatpush3.bf16.msra.mxu0 %v375_v5 }
  0x42   :  { %346 = vmatprep.subr.bf16.mxu0 %v376_v6 }
  0x45   :  { %347 = vmatpush3.bf16.msra.mxu0 %v377_v7 }
  0x46   :  { %348 = vmatprep.subr.bf16.mxu0 %v378_v8 }
  0x49   :  { %349 = vmatpush3.bf16.msra.mxu0 %v379_v9 }
  0x4a   :  { %350 = vmatprep.subr.bf16.mxu0 %v380_v10 }
  0x4d   :  { %351 = vmatpush3.bf16.msra.mxu0 %v381_v12 }
  0x4e   :  { %352 = vmatprep.subr.bf16.mxu0 %v382_v13 }
  0x51   :  { %353 = vmatpush3.bf16.msra.mxu0 %v383_v14 }
  0x52   :  { %354 = vmatprep.subr.bf16.mxu0 %v384_v15 }
  0x55   :  { %355 = vmatpush3.bf16.msra.mxu0 %v385_v16 }
  0x58   :  { %246 = vmatmul.mubr.bf16.vlgmr.msra.gmra.mrb[0].mxu0 %v386_v17 }
 0x12b   :  { %v356_v18 = vpop.f32.mrb[0].mxu0 }
 0x12c   :  { %v357_v20 = vpop.f32.mrb[1].mxu0 }
 0x12d   :  { %v358_v21 = vadd.f32 %v357_v20, %v356_v18  ;;  %v359_v22 = vpop.f32.mrb[2].mxu0 }
 0x12e   :  { %v360_v23 = vpop.f32.mrb[3].mxu0 }
 0x12f   :  { %v248_v25 = vadd.f32 %v358_v21, %v319_v19  ;;  %v361_v26 = vadd.f32 %v360_v23, %v359_v22 }
 0x131   :  { %v251_v27 = vadd.f32 %v361_v26, %v319_v19  ;;  %v256_v28 = vadd.f32 %v254_v24, %v248_v25 }
 0x133   :  { %258 = vadd.xlane.f32.xlu0 %v256_v28  ;;  %v257_v30 = vadd.f32 %v255_v29, %v251_v27 }
 0x137   :  { %260 = vadd.xlane.f32.xlu0 %v257_v30 }
 0x1c0   :  { %v259_v31 = vpop.xlane.xlu0 %258 }
 0x1c1   :  { %v263_v32 = vmul.f32 0.0078125, %v259_v31 }
 0x1c3   :  { %v265_v33 = vsub.f32 %v256_v28, %v263_v32 }
 0x1c4   :  { %v261_v34 = vpop.xlane.xlu0 %260 }
 0x1c5   :  { %v264_v35 = vmul.f32 0.0078125, %v261_v34  ;;  %v267_v36 = vmul.f32 %v265_v33, %v265_v33 }
 0x1c7   :  { %v266_v37 = vsub.f32 %v257_v30, %v264_v35  ;;  %269 = vadd.xlane.f32.xlu1 %v267_v36 }
 0x1c9   :  { %v268_v38 = vmul.f32 %v266_v37, %v266_v37 }
 0x1cb   :  { %271 = vadd.xlane.f32.xlu1 %v268_v38 }
 0x254   :  { %v270_v39 = vpop.xlane.xlu1 %269 }
 0x255   :  { %v273_v40 = vmul.f32 0.0078125, %v270_v39 }
 0x257   :  { %v275_v41 = vadd.f32 1e-12, %v273_v40 }
 0x258   :  { %v272_v42 = vpop.xlane.xlu1 %271 }
 0x259   :  { %389 = vrsqrt.f32 %v275_v41  ;;  %v274_v43 = vmul.f32 0.0078125, %v272_v42 }
 0x25b   :  { %v276_v44 = vadd.f32 1e-12, %v274_v43 }
 0x25d   :  { %391 = vrsqrt.f32 %v276_v44 }
 0x263   :  { %v390_v45 = vpop.eup %389 }
 0x264   :  { %v279_v47 = vmul.f32 %v390_v45, %v265_v33 }
 0x266   :  { %v288_v49 = vmul.f32 %v338_v46, %v279_v47 }
 0x267   :  { %v392_v50 = vpop.eup %391 }
 0x268   :  { %v280_v51 = vmul.f32 %v392_v50, %v266_v37  ;;  %v297_v52 = vadd.f32 %v339_v48, %v288_v49 }
 0x26a   :  { %v289_v53 = vmul.f32 %v338_v46, %v280_v51  ;;  %299 = vst [vmem:[#allocation8] sm:$0xff] %v297_v52 }
 0x26c   :  { %v298_v54 = vadd.f32 %v339_v48, %v289_v53 }
 0x26e   :  { %300 = vst [vmem:[#allocation8 + $0x8] sm:$0xff] %v298_v54 }
 0x26f   :  { %470 = shalt.err (!%p467_p0)
}
 0x270   :  { %s471_s18 = scalar_lea.hbm %s602_s6, 256 }
 0x271   :  { %p472_p1 = scmp.ne.s32.totalorder %s602_s6, %s471_s18  ;;  %p475_p2 = scmp.lt.u32.totalorder %s471_s18, %s602_s6 }
 0x273   :  { %p477_p3 = pnand %p475_p2, %p472_p1 }
 0x275   :  { %480 = shalt.err (!%p477_p3)
}
 0x276   :  { %312 = dma.vmem_to_hbm [thread:$0]  %s307_s16, 256, %s602_s6, [#allocation4], %s491_s1, %s491_s1, %s492_s21  }
 0x277   :  { %485 = dma.done.wait [#allocation4], 256  }
 0x278   :  { %486 = vsyncadd [#allocation4], 4294967040 }
 0x279   :  { %316 = vsyncpa [#allocation3], 1 }
 0x27a   :  { %317 = vsyncpa [#allocation6], 1 }
 0x27b   :  { %318 = vsyncpa [#allocation4], 1 }

// kernel: tpu_custom_call.1
= control target key start
LH: loop header
LB: loop body
LE: loop exit
PB: predicated region body
PF: predicated region fallthrough
CT: control target
= control target key end

     0   :  { %11 = vsyncpa [#allocation3], 0  ;;  %s596_s0 = inlined_call_operand.hbm [shape: bf16[16,256], index: 0, kind: input, shape index: {}]   ;;  %s597_s1 = inlined_call_operand.hbm [shape: bf16[256,128], index: 1, kind: input, shape index: {}]   ;;  %s598_s2 = inlined_call_operand.vmem [shape: f32[1,128], index: 2, kind: input, shape index: {}]   ;;  %s599_s3 = inlined_call_operand.hbm [shape: f32[16,128], index: 3, kind: input, shape index: {}]   ;;  %s600_s4 = inlined_call_operand.vmem [shape: f32[1,128], index: 4, kind: input, shape index: {}]   ;;  %s601_s5 = inlined_call_operand.vmem [shape: f32[1,128], index: 5, kind: input, shape index: {}]   ;;  %s602_s6 = inlined_call_operand.hbm [shape: f32[16,128], index: 6, kind: output, shape index: {}]  }
   0x1   :  { %12 = vsyncpa [#allocation6], 0 }
   0x2   :  { %13 = vsyncpa [#allocation4], 0  ;;  %s487_s21 = smov [#allocation5]   ;;  %s393_s25 = scalar_lea.hbm %s597_s1, 2048 }
   0x3   :  { %s31_s22 = sshll.u32 %s487_s21, 4  ;;  %p394_p0 = scmp.ne.s32.totalorder %s597_s1, %s393_s25  ;;  %s32_s22 = int_to_ptr.vmem [resolvable:$true] %s31_s22 }
   0x4   :  { %p397_p1 = scmp.lt.u32.totalorder %s393_s25, %s597_s1 }
   0x6   :  { %p399_p2 = pnand %p397_p1, %p394_p0 }
   0x8   :  { %402 = shalt.err (!%p399_p2)
}
   0x9   :  { %s403_s30 = scalar_lea.vmem %s32_s22, 2048  ;;  %p408_p4 = scmp.lt.s32.totalorder %s32_s22, %s32_s22 }
   0xa   :  { %p404_p3 = scmp.ne.s32.totalorder %s32_s22, %s403_s30  ;;  %p409_p5 = scmp.lt.s32.totalorder %s403_s30, %s403_s30 }
   0xc   :  { %p410_p6 = por %p409_p5, %p408_p4 }
   0xe   :  { %p411_p7 = pnand %p410_p6, %p404_p3 }
  0x10   :  { %414 = shalt.err (!%p411_p7)
}
  0x11   :  { %s488_s7 = smov 64   ;;  %s489_s8 = smov 4  }
  0x12   :  { %37 = dma.hbm_to_vmem [thread:$0]  %s597_s1, 2048, %s32_s22, [#allocation6], %s488_s7, %s488_s7, %s489_s8  }
  0x13   :  { %s490_s11 = smov [#allocation2]   ;;  %s415_s15 = scalar_lea.hbm %s596_s0, 256 }
  0x14   :  { %s19_s12 = sshll.u32 %s490_s11, 4  ;;  %p416_p8 = scmp.ne.s32.totalorder %s596_s0, %s415_s15  ;;  %s20_s12 = int_to_ptr.vmem [resolvable:$true] %s19_s12 }
  0x15   :  { %p419_p9 = scmp.lt.u32.totalorder %s415_s15, %s596_s0 }
  0x17   :  { %p421_p10 = pnand %p419_p9, %p416_p8 }
  0x19   :  { %424 = shalt.err (!%p421_p10)
}
  0x1a   :  { %s425_s20 = scalar_lea.vmem %s20_s12, 256  ;;  %p430_p12 = scmp.lt.s32.totalorder %s20_s12, %s20_s12 }
  0x1b   :  { %p426_p11 = scmp.ne.s32.totalorder %s20_s12, %s425_s20  ;;  %p431_p13 = scmp.lt.s32.totalorder %s425_s20, %s425_s20 }
  0x1d   :  { %p432_p0 = por %p431_p13, %p430_p12 }
  0x1f   :  { %p433_p1 = pnand %p432_p0, %p426_p11 }
  0x21   :  { %436 = shalt.err (!%p433_p1)
}
  0x22   :  { %s491_s1 = smov 128   ;;  %s492_s21 = smov 8  }
  0x23   :  { %25 = dma.hbm_to_vmem [thread:$0]  %s596_s0, 256, %s20_s12, [#allocation3], %s491_s1, %s491_s1, %s492_s21  }
  0x24   :  { %s493_s24 = smov [#allocation7]   ;;  %s437_s28 = scalar_lea.hbm %s599_s3, 256 }
  0x25   :  { %s45_s25 = sshll.u32 %s493_s24, 4  ;;  %p438_p2 = scmp.ne.s32.totalorder %s599_s3, %s437_s28  ;;  %s46_s25 = int_to_ptr.vmem [resolvable:$true] %s45_s25 }
  0x26   :  { %p441_p3 = scmp.lt.u32.totalorder %s437_s28, %s599_s3 }
  0x28   :  { %p443_p4 = pnand %p441_p3, %p438_p2 }
  0x2a   :  { %446 = shalt.err (!%p443_p4)
}
  0x2b   :  { %s447_s9 = scalar_lea.vmem %s46_s25, 256  ;;  %p452_p6 = scmp.lt.s32.totalorder %s46_s25, %s46_s25 }
  0x2c   :  { %p448_p5 = scmp.ne.s32.totalorder %s46_s25, %s447_s9  ;;  %p453_p7 = scmp.lt.s32.totalorder %s447_s9, %s447_s9 }
  0x2e   :  { %p454_p8 = por %p453_p7, %p452_p6 }
  0x30   :  { %p455_p9 = pnand %p454_p8, %p448_p5 }
  0x32   :  { %458 = shalt.err (!%p455_p9)
}
  0x33   :  { %51 = dma.hbm_to_vmem [thread:$0]  %s599_s3, 256, %s46_s25, [#allocation6], %s491_s1, %s491_s1, %s492_s21  }
  0x34   :  { %481 = dma.done.wait [#allocation3], 256  }
  0x35   :  { %482 = vsyncadd [#allocation3], 4294967040 }
  0x36   :  { %483 = dma.done.wait [#allocation6], 2304  }
  0x37   :  { %484 = vsyncadd [#allocation6], 4294964992  ;;  %v370_v0 = vld [vmem:[#allocation5 + $0x40] sm:$0xff]   ;;  %v372_v2 = vld [vmem:[#allocation5 + $0x48] sm:$0xff]   ;;  %s494_s15 = smov [#allocation8]  }
  0x38   :  { %v371_v1 = vld [vmem:[#allocation5] sm:$0xff]   ;;  %340 = vmatprep.subr.bf16.mxu0 %v370_v0  ;;  %v373_v3 = vld [vmem:[#allocation5 + $0x8] sm:$0xff]   ;;  %v374_v4 = vld [vmem:[#allocation5 + $0x50] sm:$0xff]   ;;  %s306_s16 = sshll.u32 %s494_s15, 4  ;;  %s307_s16 = int_to_ptr.vmem [resolvable:$true] %s306_s16 }
  0x39   :  { %341 = vmatpush3.bf16.msra.mxu0 %v371_v1  ;;  %v375_v5 = vld [vmem:[#allocation5 + $0x10] sm:$0xff]   ;;  %v376_v6 = vld [vmem:[#allocation5 + $0x58] sm:$0xff]   ;;  %v378_v8 = vld [vmem:[#allocation5 + $0x60] sm:$0xff]   ;;  %s459_s17 = scalar_lea.vmem %s307_s16, 256  ;;  %p464_p11 = scmp.lt.s32.totalorder %s307_s16, %s307_s16 }
  0x3a   :  { %342 = vmatprep.subr.bf16.mxu0 %v372_v2  ;;  %v377_v7 = vld [vmem:[#allocation5 + $0x18] sm:$0xff]   ;;  %v379_v9 = vld [vmem:[#allocation5 + $0x20] sm:$0xff]   ;;  %v380_v10 = vld [vmem:[#allocation5 + $0x68] sm:$0xff]   ;;  %p460_p10 = scmp.ne.s32.totalorder %s307_s16, %s459_s17  ;;  %p465_p12 = scmp.lt.s32.totalorder %s459_s17, %s459_s17 }
  0x3b   :  { %v388_v11 = vld [vmem:[#allocation2 + $0x4] ss:$8 sps:$4 sm:$0xff]   ;;  %v381_v12 = vld [vmem:[#allocation5 + $0x28] sm:$0xff]   ;;  %v386_v17 = vld [vmem:[#allocation2] ss:$8 sps:$4 sm:$0xff]  }
  0x3c   :  { %245 = vmatprep.mubr.bf16.mxu0 %v388_v11  ;;  %v382_v13 = vld [vmem:[#allocation5 + $0x70] sm:$0xff]   ;;  %v384_v15 = vld [vmem:[#allocation5 + $0x78] sm:$0xff]   ;;  %v254_v24 = vld [vmem:[#allocation7] sm:$0xff]  ;;  %p466_p13 = por %p465_p12, %p464_p11 }
  0x3d   :  { %343 = vmatpush3.bf16.msra.mxu0 %v373_v3  ;;  %v383_v14 = vld [vmem:[#allocation5 + $0x30] sm:$0xff]   ;;  %v385_v16 = vld [vmem:[#allocation5 + $0x38] sm:$0xff]   ;;  %v255_v29 = vld [vmem:[#allocation7 + $0x8] sm:$0xff] }
  0x3e   :  { %344 = vmatprep.subr.bf16.mxu0 %v374_v4  ;;  %v319_v19 = vld [vmem:[%s598_s2] ss:$0 sm:$0xff]  ;;  %p467_p0 = pnand %p466_p13, %p460_p10 }
  0x3f   :  { %v338_v46 = vld [vmem:[%s600_s4] ss:$0 sm:$0xff] }
  0x40   :  { %v339_v48 = vld [vmem:[%s601_s5] ss:$0 sm:$0xff] }
  0x41   :  { %345 = vmatpush3.bf16.msra.mxu0 %v375_v5 }
  0x42   :  { %346 = vmatprep.subr.bf16.mxu0 %v376_v6 }
  0x45   :  { %347 = vmatpush3.bf16.msra.mxu0 %v377_v7 }
  0x46   :  { %348 = vmatprep.subr.bf16.mxu0 %v378_v8 }
  0x49   :  { %349 = vmatpush3.bf16.msra.mxu0 %v379_v9 }
  0x4a   :  { %350 = vmatprep.subr.bf16.mxu0 %v380_v10 }
  0x4d   :  { %351 = vmatpush3.bf16.msra.mxu0 %v381_v12 }
  0x4e   :  { %352 = vmatprep.subr.bf16.mxu0 %v382_v13 }
  0x51   :  { %353 = vmatpush3.bf16.msra.mxu0 %v383_v14 }
  0x52   :  { %354 = vmatprep.subr.bf16.mxu0 %v384_v15 }
  0x55   :  { %355 = vmatpush3.bf16.msra.mxu0 %v385_v16 }
  0x58   :  { %246 = vmatmul.mubr.bf16.vlgmr.msra.gmra.mrb[0].mxu0 %v386_v17 }
 0x12b   :  { %v356_v18 = vpop.f32.mrb[0].mxu0 }
 0x12c   :  { %v357_v20 = vpop.f32.mrb[1].mxu0 }
 0x12d   :  { %v358_v21 = vadd.f32 %v357_v20, %v356_v18  ;;  %v359_v22 = vpop.f32.mrb[2].mxu0 }
 0x12e   :  { %v360_v23 = vpop.f32.mrb[3].mxu0 }
 0x12f   :  { %v248_v25 = vadd.f32 %v358_v21, %v319_v19  ;;  %v361_v26 = vadd.f32 %v360_v23, %v359_v22 }
 0x131   :  { %v251_v27 = vadd.f32 %v361_v26, %v319_v19  ;;  %v256_v28 = vadd.f32 %v254_v24, %v248_v25 }
 0x133   :  { %258 = vadd.xlane.f32.xlu0 %v256_v28  ;;  %v257_v30 = vadd.f32 %v255_v29, %v251_v27 }
 0x137   :  { %260 = vadd.xlane.f32.xlu0 %v257_v30 }
 0x1c0   :  { %v259_v31 = vpop.xlane.xlu0 %258 }
 0x1c1   :  { %v263_v32 = vmul.f32 0.0078125, %v259_v31 }
 0x1c3   :  { %v265_v33 = vsub.f32 %v256_v28, %v263_v32 }
 0x1c4   :  { %v261_v34 = vpop.xlane.xlu0 %260 }
 0x1c5   :  { %v264_v35 = vmul.f32 0.0078125, %v261_v34  ;;  %v267_v36 = vmul.f32 %v265_v33, %v265_v33 }
 0x1c7   :  { %v266_v37 = vsub.f32 %v257_v30, %v264_v35  ;;  %269 = vadd.xlane.f32.xlu1 %v267_v36 }
 0x1c9   :  { %v268_v38 = vmul.f32 %v266_v37, %v266_v37 }
 0x1cb   :  { %271 = vadd.xlane.f32.xlu1 %v268_v38 }
 0x254   :  { %v270_v39 = vpop.xlane.xlu1 %269 }
 0x255   :  { %v273_v40 = vmul.f32 0.0078125, %v270_v39 }
 0x257   :  { %v275_v41 = vadd.f32 1e-12, %v273_v40 }
 0x258   :  { %v272_v42 = vpop.xlane.xlu1 %271 }
 0x259   :  { %389 = vrsqrt.f32 %v275_v41  ;;  %v274_v43 = vmul.f32 0.0078125, %v272_v42 }
 0x25b   :  { %v276_v44 = vadd.f32 1e-12, %v274_v43 }
 0x25d   :  { %391 = vrsqrt.f32 %v276_v44 }
 0x263   :  { %v390_v45 = vpop.eup %389 }
 0x264   :  { %v279_v47 = vmul.f32 %v390_v45, %v265_v33 }
 0x266   :  { %v288_v49 = vmul.f32 %v338_v46, %v279_v47 }
 0x267   :  { %v392_v50 = vpop.eup %391 }
 0x268   :  { %v280_v51 = vmul.f32 %v392_v50, %v266_v37  ;;  %v297_v52 = vadd.f32 %v339_v48, %v288_v49 }
 0x26a   :  { %v289_v53 = vmul.f32 %v338_v46, %v280_v51  ;;  %299 = vst [vmem:[#allocation8] sm:$0xff] %v297_v52 }
 0x26c   :  { %v298_v54 = vadd.f32 %v339_v48, %v289_v53 }
 0x26e   :  { %300 = vst [vmem:[#allocation8 + $0x8] sm:$0xff] %v298_v54 }
 0x26f   :  { %470 = shalt.err (!%p467_p0)
}
 0x270   :  { %s471_s18 = scalar_lea.hbm %s602_s6, 256 }
 0x271   :  { %p472_p1 = scmp.ne.s32.totalorder %s602_s6, %s471_s18  ;;  %p475_p2 = scmp.lt.u32.totalorder %s471_s18, %s602_s6 }
 0x273   :  { %p477_p3 = pnand %p475_p2, %p472_p1 }
 0x275   :  { %480 = shalt.err (!%p477_p3)
}
 0x276   :  { %312 = dma.vmem_to_hbm [thread:$0]  %s307_s16, 256, %s602_s6, [#allocation4], %s491_s1, %s491_s1, %s492_s21  }
 0x277   :  { %485 = dma.done.wait [#allocation4], 256  }
 0x278   :  { %486 = vsyncadd [#allocation4], 4294967040 }
 0x279   :  { %316 = vsyncpa [#allocation3], 1 }
 0x27a   :  { %317 = vsyncpa [#allocation6], 1 }
 0x27b   :  { %318 = vsyncpa [#allocation4], 1 }

</bundles_post_ra>
